<compile_context>
chip_gen: v5e
topology: v5e:2x2
jax: 0.10.0
libtpu: 0.0.40
codegen_flags: <defaults>
</compile_context>

<pallas_src>
import functools

import jax
import jax.numpy as jnp
from jax import lax
from jax.experimental import pallas as pl
from jax.experimental.pallas import tpu as pltpu

LN_EPS = 1e-12  # ESM1bLayerNorm default
_INV_SQRT2 = 0.7071067811865476


def _round_up(a, b):
    return (a + b - 1) // b * b


def _vmem_capacity_bytes():
    try:
        return int(pltpu.get_tpu_info().vmem_capacity_bytes)
    except Exception:
        return 64 * 1024 * 1024  # conservative fallback (v7x per-core VMEM)


# ----------------------------------------------------------------------------
# Kernels
# ----------------------------------------------------------------------------
def _dense_gelu_ln_kernel(x_ref, wd_ref, bd_ref, g_ref, b_ref, h_ref):
    # x_ref:  (TM, D)  input rows
    # wd_ref: (D, D)   dense weight, pre-transposed to (in, out) layout
    # bd_ref: (1, D)   dense bias (f32)
    # g_ref:  (1, D)   LayerNorm gamma (f32)
    # b_ref:  (1, D)   LayerNorm beta (f32)
    # h_ref:  (TM, D)  normalized activations (compute dtype)
    x = x_ref[...].astype(wd_ref.dtype)
    h = jnp.dot(x, wd_ref[...], preferred_element_type=jnp.float32)
    h = h + bd_ref[...]

    # exact (erf) GELU, f32
    h = 0.5 * h * (1.0 + lax.erf(h * jnp.float32(_INV_SQRT2)))

    # LayerNorm over the hidden dim, f32
    mu = jnp.mean(h, axis=-1, keepdims=True)
    xc = h - mu
    var = jnp.mean(xc * xc, axis=-1, keepdims=True)
    h = xc * lax.rsqrt(var + jnp.float32(LN_EPS))
    h = h * g_ref[...] + b_ref[...]

    h_ref[...] = h.astype(h_ref.dtype)


def _projection_kernel(h_ref, wp_ref, bp_ref, o_ref):
    # h_ref:  (TM, D)   normalized activations
    # wp_ref: (D, TO)   tied-embedding weight tile, (in, out) layout
    # bp_ref: (1, TO)   output bias tile (f32)
    # o_ref:  (TM, TO)  logits tile
    logits = jnp.dot(h_ref[...], wp_ref[...],
                     preferred_element_type=jnp.float32)
    o_ref[...] = (logits + bp_ref[...]).astype(o_ref.dtype)


# ----------------------------------------------------------------------------
# One-time weight preparation (hoisted out of the per-call path)
# ----------------------------------------------------------------------------
def prepare_lm_head_params(dense_w, dense_b, ln_g, ln_b, proj_w, proj_b, *,
                           vocab_tile=1024, compute_dtype=None):
    """Transpose / pad / (optionally) bf16-cast the weights ONCE at load time.

    dense_w: (D, D), proj_w: (O, D) in PyTorch (out, in) layout.
    """
    D = dense_w.shape[0]
    O = proj_w.shape[0]
    cdt = (jnp.dtype(compute_dtype) if compute_dtype is not None
           else jnp.dtype(proj_w.dtype))

    vt = min(_round_up(int(vocab_tile), 128), _round_up(O, 128))
    Op = _round_up(O, vt)

    wd_t = jnp.asarray(dense_w, cdt).T            # (D, D), (in, out)
    wp_t = jnp.asarray(proj_w, cdt).T             # (D, O), (in, out)
    bp = jnp.asarray(proj_b, jnp.float32)
    if Op != O:
        wp_t = jnp.pad(wp_t, ((0, 0), (0, Op - O)))
        bp = jnp.pad(bp, (0, Op - O))

    return dict(
        wd_t=wd_t,
        bd=jnp.asarray(dense_b, jnp.float32).reshape(1, D),
        ln_g=jnp.asarray(ln_g, jnp.float32).reshape(1, D),
        ln_b=jnp.asarray(ln_b, jnp.float32).reshape(1, D),
        wp_t=wp_t,
        bp=bp.reshape(1, Op),
        out_dim=int(O),
        vocab_tile=int(vt),
    )


# ----------------------------------------------------------------------------
# Forward pass
# ----------------------------------------------------------------------------
@functools.partial(jax.jit,
                   static_argnames=("out_dim", "row_tile", "vocab_tile"))
def _lm_head_impl(features, wd_t, bd, g, b, wp_t, bp, *,
                  out_dim, row_tile, vocab_tile):
    B, T, D = features.shape
    N = B * T
    O = out_dim
    Op = wp_t.shape[1]
    vt = vocab_tile
    out_dtype = features.dtype
    cdt = wp_t.dtype

    x_isz = jnp.dtype(features.dtype).itemsize
    w_isz = jnp.dtype(cdt).itemsize
    h_isz = w_isz
    o_isz = jnp.dtype(out_dtype).itemsize

    # ---- row tile: sublane-pack aligned; keep >=2 row tiles (v7x 2 TCs) ----
    pack = 16 if h_isz <= 2 else 8
    n_unit = _round_up(N, pack)
    rt = min(_round_up(int(row_tile), pack), n_unit)
    if rt >= n_unit and n_unit > pack:
        rt = _round_up(-(-N // 2), pack)

    # ---- VMEM budget: ~85% of physical; scale row tile down to fit ---------
    budget = int(0.85 * _vmem_capacity_bytes())

    def dense_bytes(tm):
        return (2 * tm * D * x_isz          # x tile (double-buffered)
                + 2 * D * D * w_isz         # dense weight
                + 6 * D * 4                 # biases / gamma / beta
                + 2 * tm * D * h_isz)       # h output tile

    def proj_bytes(tm):
        return (2 * tm * D * h_isz          # h tile
                + 2 * D * vt * w_isz        # projection weight tile
                + 2 * vt * 4                # bias tile
                + 2 * tm * vt * o_isz)      # logits tile

    if 2 * D * D * w_isz + 6 * D * 4 > budget:
        raise ValueError(
            "RobertaLMHead dense (D x D) weight does not fit in VMEM on this "
            "TPU; use compute_dtype=jnp.bfloat16 in prepare_lm_head_params.")
    if 2 * D * vt * w_isz + 2 * vt * 4 > budget:
        raise ValueError(
            "vocab_tile too large for this TPU's VMEM; re-run "
            "prepare_lm_head_params with a smaller vocab_tile.")
    while rt > pack and max(dense_bytes(rt), proj_bytes(rt)) > budget:
        rt = max(pack, _round_up(rt // 2, pack))

    Np = _round_up(N, rt)

    x2d = features.reshape(N, D)
    if Np != N:
        x2d = jnp.pad(x2d, ((0, Np - N), (0, 0)))

    # ---- stage 1: dense + GELU + LayerNorm ---------------------------------
    h = pl.pallas_call(
        _dense_gelu_ln_kernel,
        out_shape=jax.ShapeDtypeStruct((Np, D), cdt),
        grid_spec=pltpu.PrefetchScalarGridSpec(
            num_scalar_prefetch=0,
            grid=(Np // rt,),
            in_specs=[
                pl.BlockSpec((rt, D), lambda i: (i, 0)),   # x rows
                pl.BlockSpec((D, D), lambda i: (0, 0)),    # dense W (in,out)
                pl.BlockSpec((1, D), lambda i: (0, 0)),    # dense bias
                pl.BlockSpec((1, D), lambda i: (0, 0)),    # ln gamma
                pl.BlockSpec((1, D), lambda i: (0, 0)),    # ln beta
            ],
            out_specs=pl.BlockSpec((rt, D), lambda i: (i, 0)),
        ),
        compiler_params=pltpu.CompilerParams(
            dimension_semantics=("parallel",),
            vmem_limit_bytes=int(min(max(int(1.25 * dense_bytes(rt)),
                                         32 * 1024 * 1024), budget)),
        ),
    )(x2d, wd_t, bd, g, b)

    # ---- stage 2: streaming projection  h @ Wp + b -------------------------
    out2d = pl.pallas_call(
        _projection_kernel,
        out_shape=jax.ShapeDtypeStruct((Np, Op), out_dtype),
        grid_spec=pltpu.PrefetchScalarGridSpec(
            num_scalar_prefetch=0,
            grid=(Np // rt, Op // vt),
            in_specs=[
                pl.BlockSpec((rt, D), lambda i, j: (i, 0)),   # h rows
                pl.BlockSpec((D, vt), lambda i, j: (0, j)),   # Wp tile
                pl.BlockSpec((1, vt), lambda i, j: (0, j)),   # bias tile
            ],
            out_specs=pl.BlockSpec((rt, vt), lambda i, j: (i, j)),
        ),
        compiler_params=pltpu.CompilerParams(
            dimension_semantics=("parallel", "arbitrary"),
            vmem_limit_bytes=int(min(max(int(1.25 * proj_bytes(rt)),
                                         32 * 1024 * 1024), budget)),
        ),
    )(h, wp_t, bp)

    return out2d[:N, :O].reshape(B, T, O)


def roberta_lm_head(features, params, *, row_tile=512):
    """features: (B, T, D); params: output of prepare_lm_head_params()."""
    return _lm_head_impl(
        features, params["wd_t"], params["bd"], params["ln_g"],
        params["ln_b"], params["wp_t"], params["bp"],
        out_dim=params["out_dim"],
        row_tile=int(row_tile),
        vocab_tile=params["vocab_tile"])


# ----------------------------------------------------------------------------
# Pure-JAX reference
# ----------------------------------------------------------------------------
def _reference(features, dense_w, dense_b, ln_g, ln_b, proj_w, proj_b):
    x = features @ dense_w.T + dense_b
    x = 0.5 * x * (1.0 + lax.erf(x / jnp.sqrt(2.0)))
    mu = jnp.mean(x, axis=-1, keepdims=True)
    var = jnp.mean((x - mu) ** 2, axis=-1, keepdims=True)
    x = (x - mu) / jnp.sqrt(var + LN_EPS) * ln_g + ln_b
    return x @ proj_w.T + proj_b


if __name__ == "__main__":
    # small shapes consistent with the module: batch=2, seq=8, dim=32, vocab=64
    B, T, D, O = 2, 8, 32, 64

    key = jax.random.PRNGKey(0)
    ks = jax.random.split(key, 3)
    features = jax.random.normal(ks[0], (B, T, D), dtype=jnp.float32)

    # deterministic synthetic parameters (shapes from __init__)
    dense_w = jax.random.normal(ks[1], (D, D), dtype=jnp.float32) * 0.05
    dense_b = jnp.zeros((D,), dtype=jnp.float32)
    ln_g = jnp.ones((D,), dtype=jnp.float32)
    ln_b = jnp.zeros((D,), dtype=jnp.float32)
    proj_w = jax.random.normal(ks[2], (O, D), dtype=jnp.float32) * 0.05  # tied
    proj_b = jnp.zeros((O,), dtype=jnp.float32)                          # bias

    # f32 path: tight check against the reference
    params = prepare_lm_head_params(dense_w, dense_b, ln_g, ln_b,
                                    proj_w, proj_b)
    out = jax.block_until_ready(roberta_lm_head(features, params))
    ref = _reference(features, dense_w, dense_b, ln_g, ln_b, proj_w, proj_b)
    assert out.shape == (B, T, O)
    assert jnp.allclose(out, ref, atol=1e-4, rtol=1e-4), "mismatch vs reference"

    # bf16 mixed-precision path (bf16 operands, f32 accumulation): sanity run
    params_bf16 = prepare_lm_head_params(dense_w, dense_b, ln_g, ln_b,
                                         proj_w, proj_b,
                                         compute_dtype=jnp.bfloat16)
    out_bf16 = jax.block_until_ready(
        roberta_lm_head(features.astype(jnp.bfloat16), params_bf16))
    assert out_bf16.shape == (B, T, O)
    assert bool(jnp.all(jnp.isfinite(out_bf16.astype(jnp.float32))))

    print("KERNEL_OK")
</pallas_src>

<mosaic_0001>
module attributes {stable_mosaic.version = 11 : i64} {
  func.func @_projection_kernel(%arg0: i32, %arg1: i32, %arg2: memref<8x32xf32, #tpu.memory_space<vmem>>, %arg3: memref<32x128xf32, #tpu.memory_space<vmem>>, %arg4: memref<1x128xf32, #tpu.memory_space<vmem>>, %arg5: memref<8x128xf32, #tpu.memory_space<vmem>>) attributes {dimension_semantics = [#tpu.dimension_semantics<parallel>, #tpu.dimension_semantics<arbitrary>], iteration_bounds = array<i64: 2, 1>, scalar_prefetch = 0 : i64, scratch_operands = 0 : i64, tpu.core_type = #tpu.core_type<tc>, window_params = [{transform_indices = @transform_0, window_bounds = array<i64: 8, 32>}, {transform_indices = @transform_1, window_bounds = array<i64: 32, 128>}, {transform_indices = @transform_2, window_bounds = array<i64: 1, 128>}, {transform_indices = @transform_3, window_bounds = array<i64: 8, 128>}]} {
    %c0 = arith.constant 0 : index
    %c0_0 = arith.constant 0 : index
    %0 = vector.load %arg2[%c0, %c0_0] : memref<8x32xf32, #tpu.memory_space<vmem>>, vector<8x32xf32>
    %c0_1 = arith.constant 0 : index
    %c0_2 = arith.constant 0 : index
    %1 = vector.load %arg3[%c0_1, %c0_2] : memref<32x128xf32, #tpu.memory_space<vmem>>, vector<32x128xf32>
    %cst = arith.constant dense<0.000000e+00> : vector<8x128xf32>
    %2 = tpu.matmul %0, %1, %cst {dimension_numbers = #tpu.dot_dimension_numbers<[1], [0], [0], [1], [0, 0, 1, 1], [], []>} : vector<8x32xf32>, vector<32x128xf32>, vector<8x128xf32> -> vector<8x128xf32>
    %c0_3 = arith.constant 0 : index
    %c0_4 = arith.constant 0 : index
    %3 = vector.load %arg4[%c0_3, %c0_4] : memref<1x128xf32, #tpu.memory_space<vmem>>, vector<1x128xf32>
    %4 = vector.broadcast %3 : vector<1x128xf32> to vector<8x128xf32>
    %5 = arith.addf %2, %4 : vector<8x128xf32>
    %c0_5 = arith.constant 0 : index
    %c0_6 = arith.constant 0 : index
    %6 = vector.load %arg5[%c0_5, %c0_6] : memref<8x128xf32, #tpu.memory_space<vmem>>, vector<8x128xf32>
    tpu.vector_store %arg5[%c0_5, %c0_6], %5 {strides = array<i32>} : memref<8x128xf32, #tpu.memory_space<vmem>>, vector<8x128xf32>,
    return
  }
  func.func @transform_0(%arg0: i32, %arg1: i32) -> (i32, i32) {
    %c0_i32 = arith.constant 0 : i32
    %c0_i32_0 = arith.constant 0 : i32
    return %arg0, %c0_i32 : i32, i32
  }
  func.func @transform_1(%arg0: i32, %arg1: i32) -> (i32, i32) {
    %c0_i32 = arith.constant 0 : i32
    %c0_i32_0 = arith.constant 0 : i32
    return %c0_i32, %arg1 : i32, i32
  }
  func.func @transform_2(%arg0: i32, %arg1: i32) -> (i32, i32) {
    %c0_i32 = arith.constant 0 : i32
    %c0_i32_0 = arith.constant 0 : i32
    return %c0_i32, %arg1 : i32, i32
  }
  func.func @transform_3(%arg0: i32, %arg1: i32) -> (i32, i32) {
    %c0_i32 = arith.constant 0 : i32
    return %arg0, %arg1 : i32, i32
  }
}

module attributes {stable_mosaic.version = 11 : i64} {
  func.func @_dense_gelu_ln_kernel(%arg0: i32, %arg1: memref<8x32xf32, #tpu.memory_space<vmem>>, %arg2: memref<32x32xf32, #tpu.memory_space<vmem>>, %arg3: memref<1x32xf32, #tpu.memory_space<vmem>>, %arg4: memref<1x32xf32, #tpu.memory_space<vmem>>, %arg5: memref<1x32xf32, #tpu.memory_space<vmem>>, %arg6: memref<8x32xf32, #tpu.memory_space<vmem>>) attributes {dimension_semantics = [#tpu.dimension_semantics<parallel>], iteration_bounds = array<i64: 2>, scalar_prefetch = 0 : i64, scratch_operands = 0 : i64, tpu.core_type = #tpu.core_type<tc>, window_params = [{transform_indices = @transform_0, window_bounds = array<i64: 8, 32>}, {pipeline_mode = #tpu.pipeline_mode<synchronous>, transform_indices = @transform_1, window_bounds = array<i64: 32, 32>}, {pipeline_mode = #tpu.pipeline_mode<synchronous>, transform_indices = @transform_2, window_bounds = array<i64: 1, 32>}, {pipeline_mode = #tpu.pipeline_mode<synchronous>, transform_indices = @transform_3, window_bounds = array<i64: 1, 32>}, {pipeline_mode = #tpu.pipeline_mode<synchronous>, transform_indices = @transform_4, window_bounds = array<i64: 1, 32>}, {transform_indices = @transform_5, window_bounds = array<i64: 8, 32>}]} {
    %c0 = arith.constant 0 : index
    %c0_0 = arith.constant 0 : index
    %0 = vector.load %arg1[%c0, %c0_0] : memref<8x32xf32, #tpu.memory_space<vmem>>, vector<8x32xf32>
    %c0_1 = arith.constant 0 : index
    %c0_2 = arith.constant 0 : index
    %1 = vector.load %arg2[%c0_1, %c0_2] : memref<32x32xf32, #tpu.memory_space<vmem>>, vector<32x32xf32>
    %cst = arith.constant dense<0.000000e+00> : vector<8x32xf32>
    %2 = tpu.matmul %0, %1, %cst {dimension_numbers = #tpu.dot_dimension_numbers<[1], [0], [0], [1], [0, 0, 1, 1], [], []>} : vector<8x32xf32>, vector<32x32xf32>, vector<8x32xf32> -> vector<8x32xf32>
    %c0_3 = arith.constant 0 : index
    %c0_4 = arith.constant 0 : index
    %3 = vector.load %arg3[%c0_3, %c0_4] : memref<1x32xf32, #tpu.memory_space<vmem>>, vector<1x32xf32>
    %4 = vector.broadcast %3 : vector<1x32xf32> to vector<8x32xf32>
    %5 = arith.addf %2, %4 : vector<8x32xf32>
    %cst_5 = arith.constant 5.000000e-01 : f32
    %6 = vector.broadcast %cst_5 : f32 to vector<8x32xf32>
    %7 = arith.mulf %6, %5 : vector<8x32xf32>
    %cst_6 = arith.constant 0.707106769 : f32
    %8 = vector.broadcast %cst_6 : f32 to vector<8x32xf32>
    %9 = arith.mulf %5, %8 : vector<8x32xf32>
    %10 = math.erf %9 : vector<8x32xf32>
    %cst_7 = arith.constant 1.000000e+00 : f32
    %11 = vector.broadcast %cst_7 : f32 to vector<8x32xf32>
    %12 = arith.addf %11, %10 : vector<8x32xf32>
    %13 = arith.mulf %7, %12 : vector<8x32xf32>
    %cst_8 = arith.constant dense<0.000000e+00> : vector<8xf32>
    %14 = vector.multi_reduction <add>, %13, %cst_8 [1] : vector<8x32xf32> to vector<8xf32>
    %15 = vector.shape_cast %14 : vector<8xf32> to vector<8x1xf32>
    %cst_9 = arith.constant 3.200000e+01 : f32
    %16 = vector.broadcast %cst_9 : f32 to vector<8x1xf32>
    %17 = arith.divf %15, %16 : vector<8x1xf32>
    %18 = vector.broadcast %17 : vector<8x1xf32> to vector<8x32xf32>
    %19 = arith.subf %13, %18 : vector<8x32xf32>
    %20 = arith.mulf %19, %19 : vector<8x32xf32>
    %cst_10 = arith.constant dense<0.000000e+00> : vector<8xf32>
    %21 = vector.multi_reduction <add>, %20, %cst_10 [1] : vector<8x32xf32> to vector<8xf32>
    %22 = vector.shape_cast %21 : vector<8xf32> to vector<8x1xf32>
    %cst_11 = arith.constant 3.200000e+01 : f32
    %23 = vector.broadcast %cst_11 : f32 to vector<8x1xf32>
    %24 = arith.divf %22, %23 : vector<8x1xf32>
    %cst_12 = arith.constant 9.99999996E-13 : f32
    %25 = vector.broadcast %cst_12 : f32 to vector<8x1xf32>
    %26 = arith.addf %24, %25 : vector<8x1xf32>
    %27 = math.rsqrt %26 : vector<8x1xf32>
    %28 = vector.broadcast %27 : vector<8x1xf32> to vector<8x32xf32>
    %29 = arith.mulf %19, %28 : vector<8x32xf32>
    %c0_13 = arith.constant 0 : index
    %c0_14 = arith.constant 0 : index
    %30 = vector.load %arg4[%c0_13, %c0_14] : memref<1x32xf32, #tpu.memory_space<vmem>>, vector<1x32xf32>
    %31 = vector.broadcast %30 : vector<1x32xf32> to vector<8x32xf32>
    %32 = arith.mulf %29, %31 : vector<8x32xf32>
    %c0_15 = arith.constant 0 : index
    %c0_16 = arith.constant 0 : index
    %33 = vector.load %arg5[%c0_15, %c0_16] : memref<1x32xf32, #tpu.memory_space<vmem>>, vector<1x32xf32>
    %34 = vector.broadcast %33 : vector<1x32xf32> to vector<8x32xf32>
    %35 = arith.addf %32, %34 : vector<8x32xf32>
    %c0_17 = arith.constant 0 : index
    %c0_18 = arith.constant 0 : index
    %36 = vector.load %arg6[%c0_17, %c0_18] : memref<8x32xf32, #tpu.memory_space<vmem>>, vector<8x32xf32>
    tpu.vector_store %arg6[%c0_17, %c0_18], %35 {strides = array<i32>} : memref<8x32xf32, #tpu.memory_space<vmem>>, vector<8x32xf32>,
    return
  }
  func.func @transform_0(%arg0: i32) -> (i32, i32) {
    %c0_i32 = arith.constant 0 : i32
    %c0_i32_0 = arith.constant 0 : i32
    return %arg0, %c0_i32 : i32, i32
  }
  func.func @transform_1(%arg0: i32) -> (i32, i32) {
    %c0_i32 = arith.constant 0 : i32
    %c0_i32_0 = arith.constant 0 : i32
    %c0_i32_1 = arith.constant 0 : i32
    return %c0_i32, %c0_i32_0 : i32, i32
  }
  func.func @transform_2(%arg0: i32) -> (i32, i32) {
    %c0_i32 = arith.constant 0 : i32
    %c0_i32_0 = arith.constant 0 : i32
    %c0_i32_1 = arith.constant 0 : i32
    return %c0_i32, %c0_i32_0 : i32, i32
  }
  func.func @transform_3(%arg0: i32) -> (i32, i32) {
    %c0_i32 = arith.constant 0 : i32
    %c0_i32_0 = arith.constant 0 : i32
    %c0_i32_1 = arith.constant 0 : i32
    return %c0_i32, %c0_i32_0 : i32, i32
  }
  func.func @transform_4(%arg0: i32) -> (i32, i32) {
    %c0_i32 = arith.constant 0 : i32
    %c0_i32_0 = arith.constant 0 : i32
    %c0_i32_1 = arith.constant 0 : i32
    return %c0_i32, %c0_i32_0 : i32, i32
  }
  func.func @transform_5(%arg0: i32) -> (i32, i32) {
    %c0_i32 = arith.constant 0 : i32
    %c0_i32_0 = arith.constant 0 : i32
    return %arg0, %c0_i32 : i32, i32
  }
}

</mosaic_0001>

<bundles_post_ra>
// kernel: _lm_head_impl.2
= control target key start
LH: loop header
LB: loop body
LE: loop exit
PB: predicated region body
PF: predicated region fallthrough
CT: control target
= control target key end

     0   :  { %10 = vsyncpa [#allocation3], 0  ;;  %s777_s0 = inlined_call_operand.hbm [shape: f32[16,32], index: 0, kind: input, shape index: {}]   ;;  %s778_s1 = inlined_call_operand.hbm [shape: f32[32,32], index: 1, kind: input, shape index: {}]   ;;  %s779_s2 = inlined_call_operand.vmem [shape: f32[1,32], index: 2, kind: input, shape index: {}]   ;;  %s780_s3 = inlined_call_operand.vmem [shape: f32[1,32], index: 3, kind: input, shape index: {}]   ;;  %s781_s4 = inlined_call_operand.vmem [shape: f32[1,32], index: 4, kind: input, shape index: {}]   ;;  %s782_s5 = inlined_call_operand.vmem [shape: f32[16,32], index: 5, kind: output, shape index: {}]  }
   0x1   :  { %12 = vsyncpa [#allocation3 + $0x1], 0 }
   0x2   :  { %13 = vsyncpa [#allocation5], 0  ;;  %s661_s18 = smov 0   ;;  %s663_s19 = smov 0  }
   0x3   :  { %s665_s20 = smov 0   ;;  %s667_s21 = smov 0  }
   0x4 LB: > { %s171_s24 = sshll.u32 %s778_s1, 4  ;;  %s683_s25 = sadd.s32 4294967295, %s625_s21   ;;  %s625_s21 = sphi %s667_s21, %s789_s21   ;;  %s621_s20 = sphi %s665_s20, %s788_s20   ;;  %s617_s19 = sphi %s663_s19, %s787_s19   ;;  %s613_s18 = sphi %s661_s18, %s786_s18   ;;  %s172_s24 = int_to_ptr.hbm [resolvable:$true] %s171_s24 }
   0x5   : > { %p452_p0 = scmp.ge.s32.totalorder %s625_s21, 1  ;;  %p40_p1 = scmp.eq.s32.totalorder %s683_s25, 0 }
   0x6   : > { %p160_p2 = scmp.lt.s32.totalorder %s625_s21, 3  ;;  %s627_s27 = smov [#allocation4]  }
   0x7   : > { %s173_s28 = sshll.u32 %s627_s27, 4  ;;  %s628_s29 = smov 128   ;;  %s174_s28 = int_to_ptr.vmem [resolvable:$true] %s173_s28 }
   0x8   : > { %p688_p3 = pnand %p452_p0, %p160_p2  ;;  %s629_s30 = smov 8  }
   0x9   : > { %s697_s6 = sadd.s32 1, %s625_s21   ;;  %s26_s8 = sadd.s32 1, %s621_s20 }
   0xa   : > { %p471_p4 = pneg %p688_p3  ;;  %s23_s7 = ssub.s32 %s625_s21, %s697_s6 }
   0xb   : > { %p24_p6 = scmp.eq.s32.totalorder %s23_s7, 0  ;;  %p33_p7 = scmp.ne.s32.totalorder %s621_s20, %s617_s19 }
   0xc   : > { %p472_p5 = pnand %p471_p4, %p40_p1  ;;  %p34_p8 = scmp.eq.s32.totalorder %s625_s21, 0 }
   0xd   : > { %p39_p9 = scmp.ne.s32.totalorder %s617_s19, %s613_s18  ;;  %p480_p12 = scmp.lt.s32.totalorder %s625_s21, 2 }
   0xe   : > { %474 = dma.hbm_to_vmem [thread:$0]  (!%p472_p5), %s172_s24, 512, %s174_s28, [#allocation5], %s628_s29, %s628_s29, %s629_s30  }
   0xf   : > { %s707_s9 = scalar_select %p24_p6, %s621_s20, %s26_s8  }
  0x10   : > { %p35_p10 = por %p34_p8, %p33_p7  ;;  %p711_p11 = por %p40_p1, %p39_p9 }
  0x11   : > { %s196_s11 = sand.u32 1, %s621_s20   ;;  %s456_s13 = sshll.u32 %s625_s21, 3 }
  0x12   : > { %s455_s12 = sshll.u32 %s196_s11, 3  ;;  %s204_s16 = scalar_lea.hbm %s777_s0, %s456_s13 }
  0x13   : > { %s200_s17 = scalar_lea.vmem [#allocation2], %s455_s12  ;;  %s206_s23 = sshll.u32 %s204_s16, 4  ;;  %s207_s23 = int_to_ptr.hbm [resolvable:$true] %s206_s23 }
  0x14   : > { %s208_s22 = sshll.u32 %s200_s17, 4  ;;  %p721_p13 = pnand %p480_p12, %p35_p10  ;;  %s209_s22 = int_to_ptr.vmem [resolvable:$true] %s208_s22 }
  0x15   : > { %s197_s24 = scalar_lea.sflag [#allocation3], %s196_s11  ;;  %s557_s27 = sshra.s32 %s207_s23, 4  ;;  %s558_s27 = int_to_ptr.hbm [resolvable:$true] %s557_s27 }
  0x16   : > { %s559_s28 = scalar_lea.hbm %s558_s27, 8  ;;  %p561_p2 = pneg %p721_p13 }
  0x17   : > { %p560_p0 = scmp.ne.s32.totalorder %s558_s27, %s559_s28  ;;  %s564_s30 = scalar_lea.hbm %s777_s0, 16 }
  0x18   : > { %p565_p6 = scmp.lt.s32.totalorder %s558_s27, %s777_s0  ;;  %p566_p7 = scmp.lt.s32.totalorder %s564_s30, %s559_s28 }
  0x19   : > { %p562_p4 = pnand %p561_p2, %p560_p0 }
  0x1a   : > { %p567_p8 = por %p566_p7, %p565_p6 }
  0x1b   : > { %p563_p5 = pneg %p562_p4 }
  0x1d   : > { %p568_p9 = pnand %p567_p8, %p563_p5 }
  0x1f   : > { %571 = shalt.err (!%p568_p9)
}
  0x20   : > { %478 = dma.hbm_to_vmem [thread:$0]  (!%p721_p13), %s207_s23, 128, %s209_s22, %s197_s24  }
  0x21   : > { %217 = sbr.rel (%p688_p3) target bundleno = 497 (0x1f1), region = 40  ;;  %s219_s11 = sand.u32 (!%p688_p3), 1, %s617_s19  }
  0x22   : > { %s458_s12 = sshll.u32 (!%p688_p3), %s219_s11, 3  ;;  %s220_s13 = scalar_lea.sflag (!%p688_p3), [#allocation3], %s219_s11 }
  0x23   : > { %s223_s14 = scalar_lea.vmem (!%p688_p3), [#allocation2], %s458_s12 }
  0x26   : > { %604 = dma.done.wait (%p711_p11), %s220_s13, 128  }
  0x27   : > { %606 = vsyncadd (%p711_p11), %s220_s13, 4294967168 }
  0x28   : > { %608 = dma.done.wait (%p40_p1), [#allocation5], 512  }
  0x29   : > { %610 = vsyncadd (%p40_p1), [#allocation5], 4294966784  ;;  %v263_v0 = vld [vmem:[#allocation4 + $0x18] sm:$0xff]  ;;  %v262_v1 = vld [vmem:[#allocation4 + $0x10] sm:$0xff]  ;;  %vm268_vm0 = vcmask 261120   ;;  %v630_v48 = vmov 32.0  }
  0x2a   : > { %284 = vmatpush.msra.mxu0 %v263_v0  ;;  %v261_v2 = vld [vmem:[#allocation4 + $0x8] sm:$0xff]  ;;  %v260_v3 = vld [vmem:[#allocation4] sm:$0xff]  ;;  %v259_v4 = vld [vmem:[%s223_s14] sm:$0xff]  ;;  %p255_p1 = scmp.lt.s32.totalorder %s683_s25, 1 }
  0x2b   : > { %v518_v5 = vld [vmem:[%s779_s2] ss:$0 sm:$0xff] }
  0x2c   : > { %285 = vmatpush.msra.mxu0 %v262_v1  ;;  %s791_s25 = smov (!%p255_p1, %s683_s25), 1 }
  0x2d   : > { %s460_s17 = sshll.u32 %s791_s25, 3 }
  0x2e   : > { %286 = vmatpush.msra.mxu0 %v261_v2  ;;  %s258_s27 = scalar_lea.vmem %s782_s5, %s460_s17 }
  0x30   : > { %287 = vmatpush.msra.mxu0 %v260_v3 }
  0x31   : > { %461 = vmatmul.msk.f32.vlgmr.msra.gmra.mxu0 %vm268_vm0, %v259_v4 }
  0xae   : > { %v289_v6 = vpop.f32.mrf.mxu0 }
  0xaf   : > { %v290_v7 = vadd.f32 %v518_v5, %v289_v6  ;;  %v519_v5 = vld [vmem:[%s780_s3] ss:$0 sm:$0xff] }
  0xb1   : > { %v293_v8 = vmul.f32 0.70710677, %v290_v7  ;;  %v292_v44 = vmul.f32 0.5, %v290_v7  ;;  %v520_v7 = vld [vmem:[%s781_s4] ss:$0 sm:$0xff] }
  0xb3   : > { %v294_v9 = vmul.f32 %v293_v8, %v293_v8 }
  0xb5   : > { %v295_v10 = vmin.f32 %v294_v9, 16.0 }
  0xb7   : > { %v296_v11 = vmul.f32 2.1237322e-06, %v295_v10  ;;  %v307_v12 = vmul.f32 3.8918573e-05, %v295_v10 }
  0xb9   : > { %v297_v13 = vadd.f32 0.00028619796, %v296_v11  ;;  %v308_v14 = vadd.f32 0.001143296, %v307_v12 }
  0xbb   : > { %v298_v15 = vmul.f32 %v297_v13, %v295_v10  ;;  %v309_v16 = vmul.f32 %v308_v14, %v295_v10 }
  0xbd   : > { %v310_v17 = vadd.f32 0.014752088, %v309_v16  ;;  %v299_v18 = vadd.f32 0.0036580483, %v298_v15 }
  0xbf   : > { %v311_v19 = vmul.f32 %v310_v17, %v295_v10  ;;  %v300_v21 = vmul.f32 %v299_v18, %v295_v10 }
  0xc1   : > { %v312_v20 = vadd.f32 0.112945676, %v311_v19  ;;  %v301_v24 = vadd.f32 0.05243302, %v300_v21 }
  0xc3   : > { %v313_v22 = vmul.f32 %v312_v20, %v295_v10  ;;  %v302_v27 = vmul.f32 %v301_v24, %v295_v10 }
  0xc5   : > { %v314_v23 = vadd.f32 0.4994258, %v313_v22  ;;  %v303_v28 = vadd.f32 0.18741608, %v302_v27 }
  0xc7   : > { %v315_v25 = vmul.f32 %v314_v23, %v295_v10  ;;  %v304_v30 = vmul.f32 %v303_v28, %v295_v10 }
  0xc9   : > { %v316_v26 = vadd.f32 1.0, %v315_v25  ;;  %v305_v34 = vadd.f32 1.1283791, %v304_v30 }
  0xcb   : > { %521 = vrcp.f32 %v316_v26  ;;  %v328_v33 = vand.u32 2147483648, %v316_v26  ;;  %v326_v36 = vand.u32 2147483647, %v316_v26  ;;  %vm322_vm2 = vweird.f32 %v316_v26 }
  0xcc   : > { %v306_v39 = vmul.f32 %v305_v34, %v293_v8  ;;  %523 = vrcp.f32 %v630_v48 }
  0xcd   : > { %v329_v38 = vor.u32 1.1754944e-38, %v328_v33  ;;  %vm327_vm4 = vcmp.eq.f32.partialorder %v326_v36, 8.507059e+37 }
  0xd1   : > { %v522_v29 = vpop.eup %521 }
  0xd2   : > { %v318_v31 = vmul.f32 %v522_v29, %v316_v26  ;;  %vm323_vm1 = vweird.f32 %v522_v29  ;;  %v524_v49 = vpop.eup %523 }
  0xd3   : > { %vm324_vm3 = vmor %vm322_vm2, %vm323_vm1  ;;  %v340_v50 = vmul.f32 32.0, %v524_v49  ;;  %vm344_vm5 = vweird.f32 %v524_v49 }
  0xd4   : > { %v319_v32 = vsub.f32 1.0, %v318_v31 }
  0xd5   : > { %v341_v51 = vsub.f32 1.0, %v340_v50 }
  0xd6   : > { %v320_v35 = vmul.f32 %v522_v29, %v319_v32 }
  0xd7   : > { %v342_v52 = vmul.f32 %v524_v49, %v341_v51 }
  0xd8   : > { %v321_v37 = vadd.f32 %v522_v29, %v320_v35 }
  0xd9   : > { %v343_v53 = vadd.f32 %v524_v49, %v342_v52 }
  0xda   : > { %v325_v40 = vsel %vm324_vm3, %v522_v29, %v321_v37 }
  0xdb   : > { %v330_v41 = vsel %vm327_vm4, %v329_v38, %v325_v40  ;;  %v345_v54 = vsel %vm344_vm5, %v524_v49, %v343_v53 }
  0xdc   : > { %v331_v42 = vmul.f32 %v330_v41, %v306_v39 }
  0xde   : > { %v462_v43 = vclamps-f32 %v331_v42, 1.0 }
  0xe0   : > { %v334_v45 = vadd.f32 1.0, %v462_v43 }
  0xe2   : > { %v335_v46 = vmul.f32 %v334_v45, %v292_v44 }
  0xe4   : > { %v336_v47 = vsel %vm268_vm0, %v335_v46, 0.0 }
  0xe5   : > { %337 = vadd.xlane.f32.xlu0 %v336_v47 }
 0x158   : > { %v338_v55 = vpop.xlane.xlu0 %337 }
 0x159   : > { %v346_v56 = vmul.f32 %v345_v54, %v338_v55 }
 0x15b   : > { %v347_v57 = vsub.f32 %v335_v46, %v346_v56 }
 0x15d   : > { %v348_v58 = vmul.f32 %v347_v57, %v347_v57 }
 0x15f   : > { %v349_v59 = vsel %vm268_vm0, %v348_v58, 0.0 }
 0x160   : > { %350 = vadd.xlane.f32.xlu0 %v349_v59 }
 0x1d3   : > { %v351_v60 = vpop.xlane.xlu0 %350 }
 0x1d4   : > { %v352_v61 = vmul.f32 %v351_v60, %v345_v54 }
 0x1d6   : > { %v353_v62 = vadd.f32 1e-12, %v352_v61 }
 0x1d8   : > { %525 = vrsqrt.f32 %v353_v62  ;;  %vm360_vm7 = vweird.f32 %v353_v62 }
 0x1de   : > { %v526_v63 = vpop.eup %525 }
 0x1df   : > { %v355_v0 = vmul.f32 %v526_v63, %v353_v62  ;;  %vm361_vm6 = vweird.f32 %v526_v63 }
 0x1e0   : > { %vm362_vm8 = vmor %vm360_vm7, %vm361_vm6 }
 0x1e1   : > { %v356_v1 = vmul.f32 %v526_v63, %v355_v0 }
 0x1e3   : > { %v357_v2 = vmul.f32 0.5, %v356_v1 }
 0x1e5   : > { %v358_v3 = vsub.f32 1.5, %v357_v2 }
 0x1e7   : > { %v359_v4 = vmul.f32 %v526_v63, %v358_v3 }
 0x1e9   : > { %v363_v6 = vsel %vm362_vm8, %v526_v63, %v359_v4 }
 0x1ea   : > { %v364_v8 = vmul.f32 %v363_v6, %v347_v57 }
 0x1ec   : > { %v369_v9 = vmul.f32 %v519_v5, %v364_v8 }
 0x1ee   : > { %v374_v10 = vadd.f32 %v520_v7, %v369_v9 }
 0x1f0   : > { %375 = vst.msk [vmem:[%s258_s27] sm:$0xff] %vm268_vm0, %v374_v10 }
 0x1f1 PF: > { %p16_p3 = scmp.ge.s32.totalorder %s697_s6, 4   ;;  %s786_s18 = smov %s617_s19 }
 0x1f2   : > { %s787_s19 = smov %s621_s20  ;;  %s788_s20 = smov %s707_s9 }
 0x1f3   : > { %s789_s21 = smov %s697_s6  ;;  %18 = sbr.rel (!%p16_p3) target bundleno = 4 (0x4), region = 84 }
 0x1f8   :  { %395 = vsyncpa [#allocation3], 1 }
 0x1f9   :  { %397 = vsyncpa [#allocation3 + $0x1], 1 }
 0x1fa   :  { %398 = vsyncpa [#allocation5], 1 }

// kernel: _lm_head_impl.3
= control target key start
LH: loop header
LB: loop body
LE: loop exit
PB: predicated region body
PF: predicated region fallthrough
CT: control target
= control target key end

     0   :  { %8 = vsyncpa [#allocation3], 0  ;;  %s488_s12 = smov 0   ;;  %s490_s13 = smov 0   ;;  %s528_s0 = inlined_call_operand.vmem [shape: f32[16,32], index: 0, kind: input, shape index: {}]   ;;  %s529_s1 = inlined_call_operand.hbm [shape: f32[32,128], index: 1, kind: input, shape index: {}]   ;;  %s530_s2 = inlined_call_operand.vmem [shape: f32[1,128], index: 2, kind: input, shape index: {}]   ;;  %s531_s3 = inlined_call_operand.vmem [shape: f32[16,128], index: 3, kind: output, shape index: {}]  }
   0x1   :  { %s492_s14 = smov 0  }
   0x2 LB: > { %s356_s15 = sadd.s32 4294967295, %s463_s14   ;;  %s26_s16 = sadd.s32 1, %s459_s13  ;;  %s463_s14 = sphi %s492_s14, %s14_s14   ;;  %s459_s13 = sphi %s490_s13, %s533_s13   ;;  %s455_s12 = sphi %s488_s12, %s532_s12  }
   0x3   : > { %p28_p0 = scmp.ge.s32.totalorder %s26_s16, 2  ;;  %p358_p1 = scmp.ge.s32.totalorder %s463_s14, 1 }
   0x4   : > { %p137_p2 = scmp.lt.s32.totalorder %s463_s14, 3  ;;  %p377_p4 = scmp.eq.s32.totalorder %s356_s15, 0 }
   0x5   : > { %s535_s16 = smov (%p28_p0, %s26_s16), 0  ;;  %s150_s19 = sshll.u32 %s529_s1, 4  ;;  %s151_s19 = int_to_ptr.hbm [resolvable:$true] %s150_s19 }
   0x6   : > { %p138_p3 = pnand %p358_p1, %p137_p2  ;;  %s465_s20 = smov [#allocation2]  }
   0x7   : > { %s152_s21 = sshll.u32 %s465_s20, 4  ;;  %s466_s22 = smov 128   ;;  %s153_s21 = int_to_ptr.vmem [resolvable:$true] %s152_s21 }
   0x8   : > { %p373_p5 = pneg %p138_p3  ;;  %s467_s23 = smov 8  }
   0x9   : > { %181 = sbr.rel (%p138_p3) target bundleno = 152 (0x98), region = 32 }
   0xa   : > { %p374_p6 = pnand %p377_p4, %p373_p5 }
   0xc   : > { %376 = dma.hbm_to_vmem [thread:$0]  (!%p374_p6), %s151_s19, 512, %s153_s21, [#allocation3], %s466_s22, %s466_s22, %s467_s23  }
   0xe   : > { %450 = dma.done.wait (%p377_p4), [#allocation3], 512  }
   0xf   : > { %452 = vsyncadd (%p377_p4), [#allocation3], 4294966784  ;;  %p210_p7 = scmp.lt.s32.totalorder %s455_s12, 1  ;;  %v228_v0 = vld [vmem:[#allocation2 + $0x18] sm:$0xff]  ;;  %v227_v1 = vld [vmem:[#allocation2 + $0x10] sm:$0xff]  ;;  %vm233_vm0 = vcmask 261120  }
  0x10   : > { %249 = vmatpush.msra.mxu0 %v228_v0  ;;  %v226_v2 = vld [vmem:[#allocation2 + $0x8] sm:$0xff]  ;;  %v225_v3 = vld [vmem:[#allocation2] sm:$0xff] }
  0x11   : > { %s537_s12 = smov (!%p210_p7, %s455_s12), 1  ;;  %v406_v5 = vld [vmem:[%s530_s2] ss:$0 sm:$0xff] }
  0x12   : > { %s364_s24 = sshll.u32 %s537_s12, 3  ;;  %250 = vmatpush.msra.mxu0 %v227_v1 }
  0x13   : > { %s213_s27 = scalar_lea.vmem %s528_s0, %s364_s24  ;;  %s223_s5 = scalar_lea.vmem %s531_s3, %s364_s24 }
  0x14   : > { %251 = vmatpush.msra.mxu0 %v226_v2  ;;  %v224_v4 = vld [vmem:[%s213_s27] sm:$0xff] }
  0x16   : > { %252 = vmatpush.msra.mxu0 %v225_v3 }
  0x17   : > { %366 = vmatmul.msk.f32.vlgmr.msra.gmra.mxu0 %vm233_vm0, %v224_v4 }
  0x94   : > { %v254_v6 = vpop.f32.mrf.mxu0 }
  0x95   : > { %v255_v7 = vadd.f32 %v406_v5, %v254_v6 }
  0x97   : > { %257 = vst [vmem:[%s223_s5] sm:$0xff] %v255_v7 }
  0x98 PF: > { %s14_s14 = sadd.s32 1, %s463_s14   ;;  %s532_s12 = smov %s459_s13 }
  0x99   : > { %p11_p8 = scmp.ge.s32.totalorder %s14_s14, 4   ;;  %s533_s13 = smov %s535_s16 }
  0x9b   :  { %13 = sbr.rel (!%p11_p8) target bundleno = 2 (0x2), region = 71 }
  0xa0   :  { %283 = vsyncpa [#allocation3], 1 }
  0xa1   :  { %285 = vsyncpa [#allocation3 + $0x1], 1 }

</bundles_post_ra>
